<compile_context>
chip_gen: v7x
topology: tpu7x:2x2x1
jax: 0.10.0
libtpu: 0.0.40
codegen_flags: <defaults>
</compile_context>

<pallas_src>
import functools

import jax
import jax.numpy as jnp
from jax.experimental import pallas as pl
from jax.experimental.pallas import tpu as pltpu


_VMEM_BUDGET_BYTES = 24 * 1024 * 1024  # conservative; leaves headroom on v7x.


def _round_up(x, m):
    return ((x + m - 1) // m) * m


def _relu_layer_kernel(x_ref, w_ref, b_ref, o_ref, *, precision):
    # Fused Linear (MXU, f32 accumulation) + bias add + ReLU (VPU).
    h = jnp.dot(
        x_ref[...], w_ref[...],
        preferred_element_type=jnp.float32, precision=precision,
    )
    h = h + b_ref[...]
    o_ref[...] = jnp.maximum(h, 0.0).astype(o_ref.dtype)


def _select_tiles(B, n_in, n_out, x_itemsize, w_itemsize, block_b, block_n):
    """Pick (eff_b, blk_n) honoring the (8,128) rule and the VMEM budget."""
    block_b = max(8, _round_up(block_b, 8))
    block_n = max(128, (block_n // 128) * 128)

    # Either the full dim (always legal) or an aligned tile that is <= the dim,
    # so a block is never larger than the array; ragged tails are masked.
    eff_b = B if B <= block_b else block_b            # full dim or multiple of 8
    blk_n = n_out if n_out <= block_n else block_n    # full dim or multiple of 128

    def vmem_bytes(eb, bn):
        eb_pad = _round_up(eb, 8)
        bn_pad = _round_up(bn, 128)
        x_b = 2 * eb_pad * _round_up(n_in, 128) * x_itemsize  # x tile (double buffered)
        w_b = 2 * _round_up(n_in, 8) * bn_pad * w_itemsize    # weight panel (double buffered)
        b_b = 2 * 8 * bn_pad * 4                              # bias (sublane padded)
        o_b = 2 * eb_pad * bn_pad * 4                         # out tile (double buffered)
        return x_b + w_b + b_b + o_b

    # Shrink the batch tile first (does not change weight traffic) ...
    min_b = min(eff_b, 128)
    while vmem_bytes(eff_b, blk_n) > _VMEM_BUDGET_BYTES and eff_b > min_b:
        eff_b = max(min_b, _round_up(eff_b // 2, 8))
    # ... then the n_out panel (only while it can stay a multiple of 128).
    while (vmem_bytes(eff_b, blk_n) > _VMEM_BUDGET_BYTES
           and blk_n % 128 == 0 and blk_n > 256):
        blk_n = max(256, _round_up(blk_n // 2, 128))

    return eff_b, blk_n, vmem_bytes(eff_b, blk_n)


@functools.partial(jax.jit, static_argnames=("block_b", "block_n", "precision"))
def relu_layer_forward(x, w, b, block_b=512, block_n=512, precision=None):
    """ReLULayer forward: relu(x @ w + b).

    x: (B, n_in) float32
    w: (n_in, n_out) -- PyTorch nn.Linear weight pre-transposed (W^T);
       float32 or bfloat16 (bf16 halves weight HBM traffic on v6e/v7x).
    b: (n_out,) or (1, n_out) float32
    """
    B, n_in = x.shape
    n_in_w, n_out = w.shape
    assert n_in == n_in_w, "weight must be stored transposed as (n_in, n_out)"
    b = b.reshape(1, n_out)

    eff_b, blk_n, vmem_est = _select_tiles(
        B, n_in, n_out, x.dtype.itemsize, w.dtype.itemsize, block_b, block_n)

    # Outer axis: n_out panels (weight fetched once per panel).
    # Inner axis: batch tiles streaming against the resident panel.
    grid = (pl.cdiv(n_out, blk_n), pl.cdiv(B, eff_b))

    kernel = functools.partial(_relu_layer_kernel, precision=precision)
    vmem_limit = int(min(64 * 1024 * 1024, max(32 * 1024 * 1024, 2 * vmem_est)))

    return pl.pallas_call(
        kernel,
        out_shape=jax.ShapeDtypeStruct((B, n_out), x.dtype),
        grid_spec=pltpu.PrefetchScalarGridSpec(
            num_scalar_prefetch=0,
            grid=grid,
            in_specs=[
                # x batch tile: changes along the inner axis only.
                pl.BlockSpec((eff_b, n_in), lambda j, i: (i, 0)),
                # weight n_out panel: changes along the outer axis only, so it
                # is DMA'd once per panel and stays resident across batch tiles.
                pl.BlockSpec((n_in, blk_n), lambda j, i: (0, j)),
                # bias panel follows the weight panel.
                pl.BlockSpec((1, blk_n), lambda j, i: (0, j)),
            ],
            out_specs=pl.BlockSpec((eff_b, blk_n), lambda j, i: (i, j)),
        ),
        compiler_params=pltpu.CompilerParams(
            dimension_semantics=("parallel", "parallel"),
            vmem_limit_bytes=vmem_limit,
        ),
    )(x, w, b)


def init_params(key, n_in, n_out, weight_dtype=jnp.float32):
    """PyTorch nn.Linear-style uniform init; weight stored transposed (n_in, n_out)."""
    kw, kb = jax.random.split(key)
    bound = 1.0 / (n_in ** 0.5)
    w = jax.random.uniform(kw, (n_in, n_out), jnp.float32, minval=-bound, maxval=bound)
    b = jax.random.uniform(kb, (1, n_out), jnp.float32, minval=-bound, maxval=bound)
    return w.astype(weight_dtype), b


def reference_forward(x, w, b):
    """Pure-JAX reference of ReLULayer.forward."""
    return jnp.maximum(x @ w.astype(jnp.float32) + b.reshape(1, -1), 0.0)


if __name__ == "__main__":
    key = jax.random.PRNGKey(0)

    def check(B, n_in, n_out, *, weight_dtype=jnp.float32, block_b=512,
              block_n=512, atol=1e-5, rtol=1e-5):
        kx, kp = jax.random.split(
            jax.random.fold_in(key, B * 7919 + n_in * 131 + n_out))
        x = jax.random.normal(kx, (B, n_in), jnp.float32)
        w, b = init_params(kp, n_in, n_out, weight_dtype)
        out = jax.block_until_ready(
            relu_layer_forward(x, w, b, block_b=block_b, block_n=block_n))
        ref = reference_forward(x, w, b)
        assert out.shape == (B, n_out)
        assert jnp.allclose(out, ref, atol=atol, rtol=rtol), (
            f"mismatch B={B} n_in={n_in} n_out={n_out} dtype={weight_dtype}")

    # Small shapes consistent with ReLULayer usage in iWGAN_LC's MLP.
    check(8, 128, 256)                                    # aligned, single tile
    check(13, 96, 200)                                    # ragged dims, no-pad masked path
    check(40, 128, 384, block_b=16, block_n=128)          # multi-tile grid, partial batch tile
    check(8, 128, 256, weight_dtype=jnp.bfloat16,         # bf16 weight streaming (v6e/v7x)
          atol=1e-2, rtol=1e-2)

    print("KERNEL_OK")
</pallas_src>

<mosaic_0001>
module attributes {stable_mosaic.version = 11 : i64} {
  func.func @_relu_layer_kernel(%arg0: i32, %arg1: i32, %arg2: memref<8x128xf32, #tpu.memory_space<vmem>>, %arg3: memref<128x256xf32, #tpu.memory_space<vmem>>, %arg4: memref<1x256xf32, #tpu.memory_space<vmem>>, %arg5: memref<8x256xf32, #tpu.memory_space<vmem>>) attributes {dimension_semantics = [#tpu.dimension_semantics<parallel>, #tpu.dimension_semantics<parallel>], iteration_bounds = array<i64: 1, 1>, scalar_prefetch = 0 : i64, scratch_operands = 0 : i64, tpu.core_type = #tpu.core_type<tc>, window_params = [{transform_indices = @transform_0, window_bounds = array<i64: 8, 128>}, {transform_indices = @transform_1, window_bounds = array<i64: 128, 256>}, {transform_indices = @transform_2, window_bounds = array<i64: 1, 256>}, {transform_indices = @transform_3, window_bounds = array<i64: 8, 256>}]} {
    %c0 = arith.constant 0 : index
    %c0_0 = arith.constant 0 : index
    %0 = vector.load %arg2[%c0, %c0_0] : memref<8x128xf32, #tpu.memory_space<vmem>>, vector<8x128xf32>
    %c0_1 = arith.constant 0 : index
    %c0_2 = arith.constant 0 : index
    %1 = vector.load %arg3[%c0_1, %c0_2] : memref<128x256xf32, #tpu.memory_space<vmem>>, vector<128x256xf32>
    %cst = arith.constant dense<0.000000e+00> : vector<8x256xf32>
    %2 = tpu.matmul %0, %1, %cst {dimension_numbers = #tpu.dot_dimension_numbers<[1], [0], [0], [1], [0, 0, 1, 1], [], []>} : vector<8x128xf32>, vector<128x256xf32>, vector<8x256xf32> -> vector<8x256xf32>
    %c0_3 = arith.constant 0 : index
    %c0_4 = arith.constant 0 : index
    %3 = vector.load %arg4[%c0_3, %c0_4] : memref<1x256xf32, #tpu.memory_space<vmem>>, vector<1x256xf32>
    %4 = vector.broadcast %3 : vector<1x256xf32> to vector<8x256xf32>
    %5 = arith.addf %2, %4 : vector<8x256xf32>
    %cst_5 = arith.constant 0.000000e+00 : f32
    %6 = vector.broadcast %cst_5 : f32 to vector<8x256xf32>
    %7 = arith.maximumf %5, %6 : vector<8x256xf32>
    %c0_6 = arith.constant 0 : index
    %c0_7 = arith.constant 0 : index
    %8 = vector.load %arg5[%c0_6, %c0_7] : memref<8x256xf32, #tpu.memory_space<vmem>>, vector<8x256xf32>
    tpu.vector_store %arg5[%c0_6, %c0_7], %7 {strides = array<i32>} : memref<8x256xf32, #tpu.memory_space<vmem>>, vector<8x256xf32>,
    return
  }
  func.func @transform_0(%arg0: i32, %arg1: i32) -> (i32, i32) {
    %c0_i32 = arith.constant 0 : i32
    %c0_i32_0 = arith.constant 0 : i32
    return %arg1, %c0_i32 : i32, i32
  }
  func.func @transform_1(%arg0: i32, %arg1: i32) -> (i32, i32) {
    %c0_i32 = arith.constant 0 : i32
    %c0_i32_0 = arith.constant 0 : i32
    return %c0_i32, %arg0 : i32, i32
  }
  func.func @transform_2(%arg0: i32, %arg1: i32) -> (i32, i32) {
    %c0_i32 = arith.constant 0 : i32
    %c0_i32_0 = arith.constant 0 : i32
    return %c0_i32, %arg0 : i32, i32
  }
  func.func @transform_3(%arg0: i32, %arg1: i32) -> (i32, i32) {
    %c0_i32 = arith.constant 0 : i32
    return %arg1, %arg0 : i32, i32
  }
}

</mosaic_0001>

<bundles_post_ra>
// kernel: relu_layer_forward.1
= control target key start
LH: loop header
LB: loop body
LE: loop exit
PB: predicated region body
PF: predicated region fallthrough
CT: control target
= control target key end

     0   :  { %8 = vsyncpa [#allocation3], 0  ;;  %s359_s0 = inlined_call_operand.hbm [shape: f32[8,128], index: 0, kind: input, shape index: {}]   ;;  %s360_s1 = inlined_call_operand.hbm [shape: f32[128,256], index: 1, kind: input, shape index: {}]   ;;  %s361_s2 = inlined_call_operand.vmem [shape: f32[1,256], index: 2, kind: input, shape index: {}]   ;;  %s362_s3 = inlined_call_operand.hbm [shape: f32[8,256], index: 3, kind: output, shape index: {}]  }
   0x1   :  { %9 = vsyncpa [#allocation6], 0 }
   0x2   :  { %10 = vsyncpa [#allocation4], 0  ;;  %s287_s12 = smov [#allocation2]   ;;  %s288_s14 = smov [#allocation5]  }
   0x3   :  { %s17_s13 = sshll.u32 %s287_s12, 4  ;;  %s26_s15 = sshll.u32 %s288_s14, 4  ;;  %s18_s13 = int_to_ptr.vmem [resolvable:$true] %s17_s13  ;;  %s313_s15 = int_to_ptr.vmem [resolvable:$true] %s26_s15 }
   0x4   :  { %s215_s18 = scalar_lea.hbm %s359_s0, 128 }
   0x5   :  { %p216_p0 = scmp.ne.s32.totalorder %s359_s0, %s215_s18  ;;  %p219_p1 = scmp.lt.u32.totalorder %s215_s18, %s359_s0 }
   0x7   :  { %p221_p2 = pnand %p219_p1, %p216_p0 }
   0x9   :  { %224 = shalt.err (!%p221_p2)
}
   0xa   :  { %s225_s23 = scalar_lea.vmem %s18_s13, 128  ;;  %p230_p4 = scmp.lt.s32.totalorder %s18_s13, %s18_s13 }
   0xb   :  { %p226_p3 = scmp.ne.s32.totalorder %s18_s13, %s225_s23  ;;  %p231_p5 = scmp.lt.s32.totalorder %s225_s23, %s225_s23 }
   0xd   :  { %p232_p6 = por %p231_p5, %p230_p4 }
   0xf   :  { %p233_p7 = pnand %p232_p6, %p226_p3 }
  0x11   :  { %236 = shalt.err (!%p233_p7)
}
  0x12   :  { %20 = dma.hbm_to_vmem [thread:$0]  %s359_s0, 128, %s18_s13, [#allocation3]  }
  0x13   :  { %s237_s28 = scalar_lea.hbm %s360_s1, 4096 }
  0x14   :  { %p238_p8 = scmp.ne.s32.totalorder %s360_s1, %s237_s28  ;;  %p241_p9 = scmp.lt.u32.totalorder %s237_s28, %s360_s1 }
  0x16   :  { %p243_p10 = pnand %p241_p9, %p238_p8 }
  0x18   :  { %246 = shalt.err (!%p243_p10)
}
  0x19   :  { %s247_s6 = scalar_lea.vmem %s313_s15, 4096  ;;  %p252_p12 = scmp.lt.s32.totalorder %s313_s15, %s313_s15 }
  0x1a   :  { %p248_p11 = scmp.ne.s32.totalorder %s313_s15, %s247_s6  ;;  %p253_p13 = scmp.lt.s32.totalorder %s247_s6, %s247_s6 }
  0x1c   :  { %p254_p0 = por %p253_p13, %p252_p12 }
  0x1e   :  { %p255_p1 = pnand %p254_p0, %p248_p11 }
  0x20   :  { %258 = shalt.err (!%p255_p1)
}
  0x21   :  { %s289_s0 = smov 256   ;;  %s290_s7 = smov 16  }
  0x22   :  { %32 = dma.hbm_to_vmem [thread:$0]  %s360_s1, 4096, %s313_s15, [#allocation6], %s289_s0, %s289_s0, %s290_s7  }
  0x23   :  { %281 = dma.done.wait [#allocation3], 128  }
  0x24   :  { %282 = vsyncadd [#allocation3], 4294967168 }
  0x25   :  { %283 = dma.done.wait [#allocation6], 4096  }
  0x26   :  { %284 = vsyncadd [#allocation6], 4294963200  ;;  %v291_v0 = vmov 0.0   ;;  %v43_v1 = vld [vmem:[#allocation5 + $0x8] sm:$0xff]  ;;  %v45_v2 = vld [vmem:[#allocation5 + $0x18] sm:$0xff]  ;;  %v76_v50 = vlaneseq  ;;  %s292_s11 = smov [#allocation7]  }
  0x27   :  { %150 = vmatprep.mubr.f32.mxu0 %v291_v0  ;;  %v42_v3 = vld [vmem:[#allocation5] sm:$0xff]  ;;  %v177_v4 = vpack.c.bf16 %v45_v2, %v43_v1  ;;  %v44_v5 = vld [vmem:[#allocation5 + $0x10] sm:$0xff]  ;;  %v47_v6 = vld [vmem:[#allocation5 + $0x28] sm:$0xff]  ;;  %s167_s12 = sshll.u32 %s292_s11, 4  ;;  %s168_s12 = int_to_ptr.vmem [resolvable:$true] %s167_s12 }
  0x28   :  { %v49_v7 = vld [vmem:[#allocation5 + $0x38] sm:$0xff]  ;;  %v179_v8 = vpack.c.bf16 %v44_v5, %v42_v3  ;;  %v46_v10 = vld [vmem:[#allocation5 + $0x20] sm:$0xff]  ;;  %v48_v11 = vld [vmem:[#allocation5 + $0x30] sm:$0xff]  ;;  %v77_v51 = vshrl.u32 %v76_v50, 7  ;;  %s259_s13 = scalar_lea.vmem %s168_s12, 256  ;;  %p264_p3 = scmp.lt.s32.totalorder %s168_s12, %s168_s12 }
  0x29   :  { %v181_v9 = vpack.c.bf16 %v49_v7, %v47_v6  ;;  %v51_v12 = vld [vmem:[#allocation5 + $0x48] sm:$0xff]  ;;  %178 = vmatprep.subr.bf16.mxu0 %v177_v4  ;;  %v53_v13 = vld [vmem:[#allocation5 + $0x58] sm:$0xff]  ;;  %v183_v14 = vpack.c.bf16 %v48_v11, %v46_v10  ;;  %v50_v16 = vld [vmem:[#allocation5 + $0x40] sm:$0xff]  ;;  %p260_p2 = scmp.ne.s32.totalorder %s168_s12, %s259_s13  ;;  %p265_p4 = scmp.lt.s32.totalorder %s259_s13, %s259_s13 }
  0x2a   :  { %180 = vmatpush1.bf16.msra.mxu0 %v179_v8  ;;  %v185_v15 = vpack.c.bf16 %v53_v13, %v51_v12  ;;  %v52_v17 = vld [vmem:[#allocation5 + $0x50] sm:$0xff]  ;;  %v55_v18 = vld [vmem:[#allocation5 + $0x68] sm:$0xff]  ;;  %v57_v19 = vld [vmem:[#allocation5 + $0x78] sm:$0xff]  ;;  %v78_v52 = vsub.s32 0, %v77_v51  ;;  %v82_v54 = vsub.s32 1, %v77_v51 }
  0x2b   :  { %182 = vmatprep.subr.bf16.mxu0 %v181_v9  ;;  %v187_v20 = vpack.c.bf16 %v52_v17, %v50_v16  ;;  %v189_v21 = vpack.c.bf16 %v57_v19, %v55_v18  ;;  %v54_v22 = vld [vmem:[#allocation5 + $0x60] sm:$0xff]  ;;  %v56_v23 = vld [vmem:[#allocation5 + $0x70] sm:$0xff]  ;;  %v59_v24 = vld [vmem:[#allocation5 + $0x88] sm:$0xff]  ;;  %p266_p5 = por %p265_p4, %p264_p3 }
  0x2c   :  { %v61_v25 = vld [vmem:[#allocation5 + $0x98] sm:$0xff]  ;;  %v191_v26 = vpack.c.bf16 %v56_v23, %v54_v22  ;;  %v58_v28 = vld [vmem:[#allocation5 + $0x80] sm:$0xff]  ;;  %v60_v29 = vld [vmem:[#allocation5 + $0x90] sm:$0xff] }
  0x2d   :  { %v193_v27 = vpack.c.bf16 %v61_v25, %v59_v24  ;;  %v63_v30 = vld [vmem:[#allocation5 + $0xa8] sm:$0xff]  ;;  %v65_v31 = vld [vmem:[#allocation5 + $0xb8] sm:$0xff]  ;;  %v195_v32 = vpack.c.bf16 %v60_v29, %v58_v28  ;;  %v62_v34 = vld [vmem:[#allocation5 + $0xa0] sm:$0xff]  ;;  %p267_p6 = pnand %p266_p5, %p260_p2 }
  0x2e   :  { %184 = vmatpush1.bf16.msra.mxu0 %v183_v14  ;;  %v197_v33 = vpack.c.bf16 %v65_v31, %v63_v30  ;;  %v64_v35 = vld [vmem:[#allocation5 + $0xb0] sm:$0xff]  ;;  %v67_v36 = vld [vmem:[#allocation5 + $0xc8] sm:$0xff]  ;;  %v69_v37 = vld [vmem:[#allocation5 + $0xd8] sm:$0xff] }
  0x2f   :  { %186 = vmatprep.subr.bf16.mxu0 %v185_v15  ;;  %v199_v38 = vpack.c.bf16 %v64_v35, %v62_v34  ;;  %v201_v39 = vpack.c.bf16 %v69_v37, %v67_v36  ;;  %v66_v40 = vld [vmem:[#allocation5 + $0xc0] sm:$0xff]  ;;  %v68_v41 = vld [vmem:[#allocation5 + $0xd0] sm:$0xff]  ;;  %v71_v42 = vld [vmem:[#allocation5 + $0xe8] sm:$0xff] }
  0x30   :  { %v73_v43 = vld [vmem:[#allocation5 + $0xf8] sm:$0xff]  ;;  %v203_v44 = vpack.c.bf16 %v68_v41, %v66_v40  ;;  %v70_v46 = vld [vmem:[#allocation5 + $0xe0] sm:$0xff]  ;;  %v72_v47 = vld [vmem:[#allocation5 + $0xf0] sm:$0xff] }
  0x31   :  { %v205_v45 = vpack.c.bf16 %v73_v43, %v71_v42  ;;  %v207_v48 = vpack.c.bf16 %v72_v47, %v70_v46  ;;  %v41_v49 = vld [vmem:[#allocation2] sm:$0xff] }
  0x32   :  { %188 = vmatpush1.bf16.msra.mxu0 %v187_v20  ;;  %v74_v53 = vld [vmem:[%s361_s2] sm:$0x3] }
  0x33   :  { %190 = vmatprep.subr.bf16.mxu0 %v189_v21  ;;  %v79_v55 = vrot.slane %v74_v53, %v78_v52  ;;  %v83_v56 = vrot.slane %v74_v53, %v82_v54 }
  0x36   :  { %192 = vmatpush1.bf16.msra.mxu0 %v191_v26 }
  0x37   :  { %194 = vmatprep.subr.bf16.mxu0 %v193_v27 }
  0x3a   :  { %196 = vmatpush1.bf16.msra.mxu0 %v195_v32 }
  0x3b   :  { %198 = vmatprep.subr.bf16.mxu0 %v197_v33 }
  0x3e   :  { %200 = vmatpush1.bf16.msra.mxu0 %v199_v38 }
  0x3f   :  { %202 = vmatprep.subr.bf16.mxu0 %v201_v39 }
  0x42   :  { %204 = vmatpush1.bf16.msra.mxu0 %v203_v44 }
  0x43   :  { %206 = vmatprep.subr.bf16.mxu0 %v205_v45 }
  0x46   :  { %208 = vmatpush1.bf16.msra.mxu0 %v207_v48 }
  0x49   :  { %151 = vmatmul.mubr.f32.vlgmr.msra.gmra.mrb[0].mxu0 %v41_v49 }
 0x11c   :  { %v152_v57 = vpop.f32.mrb[0].mxu0 }
 0x11d   :  { %v153_v58 = vadd.f32 %v152_v57, %v79_v55  ;;  %v154_v59 = vpop.f32.mrb[1].mxu0 }
 0x11e   :  { %v155_v60 = vadd.f32 %v154_v59, %v83_v56 }
 0x11f   :  { %v157_v61 = vmax.f32 %v153_v58, 0.0 }
 0x120   :  { %v158_v62 = vmax.f32 %v155_v60, 0.0 }
 0x121   :  { %159 = vst [vmem:[#allocation7] sm:$0xff] %v157_v61 }
 0x122   :  { %160 = vst [vmem:[#allocation7 + $0x8] sm:$0xff] %v158_v62 }
 0x123   :  { %270 = shalt.err (!%p267_p6)
}
 0x124   :  { %s271_s15 = scalar_lea.hbm %s362_s3, 256 }
 0x125   :  { %p272_p7 = scmp.ne.s32.totalorder %s362_s3, %s271_s15  ;;  %p275_p8 = scmp.lt.u32.totalorder %s271_s15, %s362_s3 }
 0x127   :  { %p277_p9 = pnand %p275_p8, %p272_p7 }
 0x129   :  { %280 = shalt.err (!%p277_p9)
}
 0x12a   :  { %170 = dma.vmem_to_hbm [thread:$0]  %s168_s12, 256, %s362_s3, [#allocation4]  }
 0x12b   :  { %285 = dma.done.wait [#allocation4], 256  }
 0x12c   :  { %286 = vsyncadd [#allocation4], 4294967040 }
 0x12d   :  { %174 = vsyncpa [#allocation3], 1 }
 0x12e   :  { %175 = vsyncpa [#allocation6], 1 }
 0x12f   :  { %176 = vsyncpa [#allocation4], 1 }

</bundles_post_ra>
